<compile_context>
chip_gen: v7x
topology: tpu7x:2x2x1
jax: 0.10.0
libtpu: 0.0.40
codegen_flags: <defaults>
</compile_context>

<pallas_src>
import jax
import jax.numpy as jnp
from jax.experimental import pallas as pl
from jax.experimental.pallas import tpu as pltpu

DIM = 32    # state dimension of the dynamical system
HID = 64    # hidden width of the base-system MLP vector field
LANE = 128  # lane width: batch tiles are multiples of this
CAP = 8192  # max batch columns per grid step (x tile = 32*8192*4B = 1 MiB)


def _round_up(n, m):
    return ((n + m - 1) // m) * m


def _cdiv(a, b):
    return -(-a // b)


def _fused_vf_kernel(xT_ref, aT_ref, c1T_ref, b2T_ref, c2T_ref, oT_ref):
    # Lane-dense transposed layout: batch on the lane (last) axis.
    #   hT   = A^T  @ xT        + c1^T    -> (HID, tb)
    #   outT = B2^T @ tanh(hT)  + c2^T    -> (DIM, tb)
    h = jnp.dot(aT_ref[...], xT_ref[...],
                preferred_element_type=jnp.float32) + c1T_ref[...]
    act = jnp.tanh(h)                                             # EUP
    oT_ref[...] = (jnp.dot(b2T_ref[...], act,
                           preferred_element_type=jnp.float32)
                   + c2T_ref[...]).astype(oT_ref.dtype)


def init_params(key):
    k = jax.random.split(key, 6)
    w = jnp.eye(DIM, dtype=jnp.float32) + 0.1 * jax.random.normal(k[0], (DIM, DIM), jnp.float32)
    b = 0.1 * jax.random.normal(k[1], (1, DIM), jnp.float32)
    w1 = jax.random.normal(k[2], (DIM, HID), jnp.float32) / jnp.sqrt(float(DIM))
    b1 = 0.1 * jax.random.normal(k[3], (1, HID), jnp.float32)
    w2 = jax.random.normal(k[4], (HID, DIM), jnp.float32) / jnp.sqrt(float(HID))
    b2 = 0.1 * jax.random.normal(k[5], (1, DIM), jnp.float32)
    winv = jnp.linalg.inv(w)  # inverse of the affine diffeomorphism (computed once, outside)
    return (w, b, w1, b1, w2, b2, winv)


def fuse_params(params):
    """Fold phi / phi^-1 into the MLP weights (once, outside the kernel), transposed."""
    w, b, w1, b1, w2, b2, winv = params
    aT = (w @ w1).T.astype(jnp.float32)             # (HID, DIM)
    c1T = (b @ w1 + b1).T.astype(jnp.float32)       # (HID, 1)
    b2T = (w2 @ winv).T.astype(jnp.float32)         # (DIM, HID)
    c2T = ((b2 - b) @ winv).T.astype(jnp.float32)   # (DIM, 1)
    return aT, c1T, b2T, c2T


def phi_inv_system_phi(t, x, fused):
    del t  # autonomous base system: the vector field does not depend on t
    x = jnp.asarray(x, jnp.float32)
    if x.ndim == 1:
        x = x[None, :]                   # torch: x.unsqueeze(0)
    B, D = x.shape
    aT, c1T, b2T, c2T = fused
    H = aT.shape[0]

    # --- batch tiling: the batch lives on the lane axis ---------------------
    pb = max(LANE, _round_up(B, LANE))   # lane-dense padding (multiple of 128)
    nb = _cdiv(pb, CAP)
    if nb > 1 or pb >= 2048:
        nb = max(nb, 2)                  # >=2 grid steps -> both v7x TCs get work
        if nb % 2:
            nb += 1
    tb = _round_up(_cdiv(pb, nb), LANE)  # tile sized from the actual batch, not a fixed 512
    pb = nb * tb

    xT = x.T                             # (DIM, B): wrapper-side layout plumbing
    if pb != B:
        xT = jnp.pad(xT, ((0, 0), (0, pb - B)))

    const = lambda i: (0, 0)             # weights: same VMEM-resident block every step
    cost = pl.CostEstimate(
        flops=2 * pb * (D * H + H * D),
        transcendentals=pb * H,
        bytes_accessed=(2 * pb * D * 4                       # xT in, outT out
                        + (H * D + D * H + H + D) * 4))       # fused weights + biases

    outT = pl.pallas_call(
        _fused_vf_kernel,
        out_shape=jax.ShapeDtypeStruct((D, pb), jnp.float32),
        grid_spec=pltpu.PrefetchScalarGridSpec(
            num_scalar_prefetch=0,
            grid=(nb,),
            in_specs=[
                pl.BlockSpec((D, tb), lambda i: (0, i)),
                pl.BlockSpec(aT.shape, const),
                pl.BlockSpec(c1T.shape, const),
                pl.BlockSpec(b2T.shape, const),
                pl.BlockSpec(c2T.shape, const),
            ],
            out_specs=pl.BlockSpec((D, tb), lambda i: (0, i)),
        ),
        compiler_params=pltpu.CompilerParams(
            dimension_semantics=("parallel",),
            # tiles are ~4 MiB double-buffered: comfortably under v7x's 32 MiB
            # default-scoped / 64 MiB physical VMEM (and v5e/v6e's 128 MiB).
            vmem_limit_bytes=32 * 1024 * 1024,
        ),
        cost_estimate=cost,
    )(xT, aT, c1T, b2T, c2T)

    out = outT[:, :B].T                  # back to (B, DIM)
    # torch: dx_dt_transformed.squeeze(0) -> drops dim 0 whenever it has size 1
    # (this includes 2-D inputs of shape (1, DIM), exactly as in the PyTorch module).
    if out.shape[0] == 1:
        out = jnp.squeeze(out, axis=0)
    return out


def _reference_original(t, x, params):
    """Exact f32 math of the original (un-fused) module: phi^-1(f(t, phi(x)))."""
    del t
    x = jnp.asarray(x, jnp.float32)
    if x.ndim == 1:
        x = x[None, :]
    w, b, w1, b1, w2, b2, winv = params
    y = x @ w + b
    f = jnp.tanh(y @ w1 + b1) @ w2 + b2
    out = (f - b) @ winv
    if out.shape[0] == 1:
        out = jnp.squeeze(out, axis=0)
    return out


def _reference_fused(t, x, fused):
    """Same fused f32 math as the kernel, in plain JAX (row-major layout)."""
    del t
    x = jnp.asarray(x, jnp.float32)
    if x.ndim == 1:
        x = x[None, :]
    aT, c1T, b2T, c2T = fused
    h = x @ aT.T + c1T.T
    out = jnp.tanh(h) @ b2T.T + c2T.T
    if out.shape[0] == 1:
        out = jnp.squeeze(out, axis=0)
    return out


def _check(t, x, params, fused):
    out = jax.block_until_ready(phi_inv_system_phi(t, x, fused))
    ref_fused = _reference_fused(t, x, fused)
    ref_orig = _reference_original(t, x, params)
    assert out.shape == ref_orig.shape, (out.shape, ref_orig.shape)
    # Tight check against the fused-f32 reference (identical math to the kernel).
    assert jnp.allclose(out, ref_fused, atol=1e-3, rtol=1e-3), \
        float(jnp.max(jnp.abs(out - ref_fused)))
    # Check against the exact un-fused module (f32 re-association only).
    assert jnp.allclose(out, ref_orig, atol=5e-3, rtol=5e-3), \
        float(jnp.max(jnp.abs(out - ref_orig)))
    return out


if __name__ == "__main__":
    key = jax.random.PRNGKey(0)
    kx, kp = jax.random.split(key)
    params = init_params(kp)
    fused = fuse_params(params)
    t = jnp.float32(0.0)

    # batched input (B, DIM)
    x_batched = jax.random.normal(kx, (8, DIM), jnp.float32)
    _check(t, x_batched, params, fused)

    # batch not a multiple of the lane tile (exercises the padding path)
    x_odd = jax.random.normal(jax.random.PRNGKey(1), (5, DIM), jnp.float32)
    _check(t, x_odd, params, fused)

    # B=600 -> padded to 640 (single block, no more 1024-row over-padding)
    x_big = jax.random.normal(jax.random.PRNGKey(2), (600, DIM), jnp.float32)
    _check(t, x_big, params, fused)

    # B=2500 -> 2-step grid (even grid length for v7x megacore sharding)
    x_huge = jax.random.normal(jax.random.PRNGKey(5), (2500, DIM), jnp.float32)
    _check(t, x_huge, params, fused)

    # 1-D input path (mirrors torch's unsqueeze(0) / squeeze(0))
    x_1d = jax.random.normal(jax.random.PRNGKey(3), (DIM,), jnp.float32)
    out1 = _check(t, x_1d, params, fused)
    assert out1.shape == (DIM,)

    # 2-D input of shape (1, DIM): torch's .squeeze(0) drops the size-1 batch dim
    x_b1 = jax.random.normal(jax.random.PRNGKey(4), (1, DIM), jnp.float32)
    out_b1 = _check(t, x_b1, params, fused)
    assert out_b1.shape == (DIM,)

    print("KERNEL_OK")
</pallas_src>

<mosaic_0001>
module attributes {stable_mosaic.version = 11 : i64} {
  func.func @_fused_vf_kernel(%arg0: i32, %arg1: memref<32x128xf32, #tpu.memory_space<vmem>>, %arg2: memref<64x32xf32, #tpu.memory_space<vmem>>, %arg3: memref<64x1xf32, #tpu.memory_space<vmem>>, %arg4: memref<32x64xf32, #tpu.memory_space<vmem>>, %arg5: memref<32x1xf32, #tpu.memory_space<vmem>>, %arg6: memref<32x128xf32, #tpu.memory_space<vmem>>) attributes {dimension_semantics = [#tpu.dimension_semantics<parallel>], iteration_bounds = array<i64: 1>, scalar_prefetch = 0 : i64, scratch_operands = 0 : i64, tpu.core_type = #tpu.core_type<tc>, window_params = [{transform_indices = @transform_0, window_bounds = array<i64: 32, 128>}, {pipeline_mode = #tpu.pipeline_mode<synchronous>, transform_indices = @transform_1, window_bounds = array<i64: 64, 32>}, {pipeline_mode = #tpu.pipeline_mode<synchronous>, transform_indices = @transform_2, window_bounds = array<i64: 64, 1>}, {pipeline_mode = #tpu.pipeline_mode<synchronous>, transform_indices = @transform_3, window_bounds = array<i64: 32, 64>}, {pipeline_mode = #tpu.pipeline_mode<synchronous>, transform_indices = @transform_4, window_bounds = array<i64: 32, 1>}, {transform_indices = @transform_5, window_bounds = array<i64: 32, 128>}]} {
    %c0 = arith.constant 0 : index
    %c0_0 = arith.constant 0 : index
    %0 = vector.load %arg2[%c0, %c0_0] : memref<64x32xf32, #tpu.memory_space<vmem>>, vector<64x32xf32>
    %c0_1 = arith.constant 0 : index
    %c0_2 = arith.constant 0 : index
    %1 = vector.load %arg1[%c0_1, %c0_2] : memref<32x128xf32, #tpu.memory_space<vmem>>, vector<32x128xf32>
    %cst = arith.constant dense<0.000000e+00> : vector<64x128xf32>
    %2 = tpu.matmul %0, %1, %cst {dimension_numbers = #tpu.dot_dimension_numbers<[1], [0], [0], [1], [0, 0, 1, 1], [], []>} : vector<64x32xf32>, vector<32x128xf32>, vector<64x128xf32> -> vector<64x128xf32>
    %c0_3 = arith.constant 0 : index
    %c0_4 = arith.constant 0 : index
    %3 = vector.load %arg3[%c0_3, %c0_4] : memref<64x1xf32, #tpu.memory_space<vmem>>, vector<64x1xf32>
    %4 = vector.broadcast %3 : vector<64x1xf32> to vector<64x128xf32>
    %5 = arith.addf %2, %4 : vector<64x128xf32>
    %6 = math.tanh %5 : vector<64x128xf32>
    %c0_5 = arith.constant 0 : index
    %c0_6 = arith.constant 0 : index
    %7 = vector.load %arg4[%c0_5, %c0_6] : memref<32x64xf32, #tpu.memory_space<vmem>>, vector<32x64xf32>
    %cst_7 = arith.constant dense<0.000000e+00> : vector<32x128xf32>
    %8 = tpu.matmul %7, %6, %cst_7 {dimension_numbers = #tpu.dot_dimension_numbers<[1], [0], [0], [1], [0, 0, 1, 1], [], []>} : vector<32x64xf32>, vector<64x128xf32>, vector<32x128xf32> -> vector<32x128xf32>
    %c0_8 = arith.constant 0 : index
    %c0_9 = arith.constant 0 : index
    %9 = vector.load %arg5[%c0_8, %c0_9] : memref<32x1xf32, #tpu.memory_space<vmem>>, vector<32x1xf32>
    %10 = vector.broadcast %9 : vector<32x1xf32> to vector<32x128xf32>
    %11 = arith.addf %8, %10 : vector<32x128xf32>
    %c0_10 = arith.constant 0 : index
    %c0_11 = arith.constant 0 : index
    %12 = vector.load %arg6[%c0_10, %c0_11] : memref<32x128xf32, #tpu.memory_space<vmem>>, vector<32x128xf32>
    tpu.vector_store %arg6[%c0_10, %c0_11], %11 {strides = array<i32>} : memref<32x128xf32, #tpu.memory_space<vmem>>, vector<32x128xf32>,
    return
  }
  func.func @transform_0(%arg0: i32) -> (i32, i32) {
    %c0_i32 = arith.constant 0 : i32
    %c0_i32_0 = arith.constant 0 : i32
    return %c0_i32, %arg0 : i32, i32
  }
  func.func @transform_1(%arg0: i32) -> (i32, i32) {
    %c0_i32 = arith.constant 0 : i32
    %c0_i32_0 = arith.constant 0 : i32
    %c0_i32_1 = arith.constant 0 : i32
    return %c0_i32, %c0_i32_0 : i32, i32
  }
  func.func @transform_2(%arg0: i32) -> (i32, i32) {
    %c0_i32 = arith.constant 0 : i32
    %c0_i32_0 = arith.constant 0 : i32
    %c0_i32_1 = arith.constant 0 : i32
    return %c0_i32, %c0_i32_0 : i32, i32
  }
  func.func @transform_3(%arg0: i32) -> (i32, i32) {
    %c0_i32 = arith.constant 0 : i32
    %c0_i32_0 = arith.constant 0 : i32
    %c0_i32_1 = arith.constant 0 : i32
    return %c0_i32, %c0_i32_0 : i32, i32
  }
  func.func @transform_4(%arg0: i32) -> (i32, i32) {
    %c0_i32 = arith.constant 0 : i32
    %c0_i32_0 = arith.constant 0 : i32
    %c0_i32_1 = arith.constant 0 : i32
    return %c0_i32, %c0_i32_0 : i32, i32
  }
  func.func @transform_5(%arg0: i32) -> (i32, i32) {
    %c0_i32 = arith.constant 0 : i32
    %c0_i32_0 = arith.constant 0 : i32
    return %c0_i32, %arg0 : i32, i32
  }
}

</mosaic_0001>

<bundles_post_ra>
// kernel: tpu_custom_call.1
= control target key start
LH: loop header
LB: loop body
LE: loop exit
PB: predicated region body
PF: predicated region fallthrough
CT: control target
= control target key end

     0   :  { %vm81_vm0 = vcmask 261120   ;;  %v513_v6 = vmov 0   ;;  %s655_s0 = inlined_call_operand.vmem [shape: f32[32,128], index: 0, kind: input, shape index: {}]   ;;  %s656_s1 = inlined_call_operand.vmem [shape: f32[64,32], index: 1, kind: input, shape index: {}]   ;;  %s657_s2 = inlined_call_operand.vmem [shape: f32[64,1], index: 2, kind: input, shape index: {}]   ;;  %s658_s3 = inlined_call_operand.vmem [shape: f32[32,64], index: 3, kind: input, shape index: {}]   ;;  %s659_s4 = inlined_call_operand.vmem [shape: f32[32,1], index: 4, kind: input, shape index: {}]   ;;  %s660_s5 = inlined_call_operand.hbm [shape: f32[32,128], index: 5, kind: output, shape index: {}]  }
   0x1   :  { %v29_v0 = vld [vmem:[%s655_s0] sm:$0xff]  ;;  %v30_v1 = vld [vmem:[%s655_s0 + $0x8] sm:$0xff]  ;;  %v31_v2 = vld [vmem:[%s655_s0 + $0x10] sm:$0xff]  ;;  %471 = vset.pattern.permute.xlu0 %v513_v6  ;;  %472 = vset.pattern.permute.xlu1 %v513_v6 }
   0x2   :  { %v443_v3 = vpack.c.bf16 %v30_v1, %v29_v0  ;;  %v32_v4 = vld [vmem:[%s655_s0 + $0x18] sm:$0xff]  ;;  %v21_v5 = vld [vmem:[%s656_s1] sm:$0xff]  ;;  %v35_v9 = vld [vmem:[%s657_s2 + $0x10] sm:$0xff] }
   0x3   :  { %v447_v7 = vpack.c.bf16 %v32_v4, %v31_v2  ;;  %409 = vmatprep.mubr.msk.f32.mxu0 %vm81_vm0, %v21_v5  ;;  %v33_v8 = vld [vmem:[%s657_s2] sm:$0xff]  ;;  %53 = vperm.xlu1 %472, %v35_v9   ;;  %v34_v10 = vld [vmem:[%s657_s2 + $0x8] sm:$0xff]  ;;  %v36_v11 = vld [vmem:[%s657_s2 + $0x18] sm:$0xff] }
   0x4   :  { %444 = vmatprep.subr.bf16.mxu0 %v443_v3  ;;  %43 = vperm.xlu0 %471, %v33_v8   ;;  %v22_v12 = vld [vmem:[%s656_s1 + $0x8] sm:$0xff] }
   0x5   :  { %446 = vmatpush3.bf16.msra.mxu0 %v443_v3 }
   0x6   :  { %448 = vmatprep.subr.bf16.mxu0 %v447_v7 }
   0x9   :  { %450 = vmatpush3.bf16.msra.mxu0 %v447_v7 }
   0xa   :  { %10 = vsyncpa [#allocation3], 0  ;;  %v23_v13 = vld [vmem:[%s656_s1 + $0x10] sm:$0xff]  ;;  %48 = vperm.xlu0 %471, %v34_v10   ;;  %58 = vperm.xlu1 %472, %v36_v11   ;;  %v37_v14 = vld [vmem:[%s657_s2 + $0x20] sm:$0xff]  ;;  %vm247_vm1 = vcmask 523264   ;;  %s514_s19 = smov [#allocation2]  }
   0xb   :  { %v38_v15 = vld [vmem:[%s657_s2 + $0x28] sm:$0xff]  ;;  %v24_v16 = vld [vmem:[%s656_s1 + $0x18] sm:$0xff]  ;;  %v25_v17 = vld [vmem:[%s656_s1 + $0x20] sm:$0xff]  ;;  %s354_s20 = sshll.u32 %s514_s19, 4  ;;  %s355_s20 = int_to_ptr.vmem [resolvable:$true] %s354_s20 }
   0xc   :  { %410 = vmatmul.mubr.msk.f32.vlgmr.msra.gmra.mrb[0].mxu0 %vm81_vm0, %v22_v12  ;;  %v39_v18 = vld [vmem:[%s657_s2 + $0x30] sm:$0xff]  ;;  %v40_v19 = vld [vmem:[%s657_s2 + $0x38] sm:$0xff]  ;;  %v26_v20 = vld [vmem:[%s656_s1 + $0x28] sm:$0xff]  ;;  %p494_p1 = scmp.lt.s32.totalorder %s355_s20, %s355_s20 }
   0xd   :  { %412 = vmatprep.mubr.msk.f32.mxu0 %vm81_vm0, %v23_v13  ;;  %v27_v21 = vld [vmem:[%s656_s1 + $0x30] sm:$0xff]  ;;  %v223_v22 = vld [vmem:[%s659_s4] sm:$0xff]  ;;  %v224_v23 = vld [vmem:[%s659_s4 + $0x8] sm:$0xff] }
   0xe   :  { %63 = vperm.xlu0 %471, %v37_v14   ;;  %68 = vperm.xlu1 %472, %v38_v15   ;;  %v28_v24 = vld [vmem:[%s656_s1 + $0x38] sm:$0xff]  ;;  %v225_v25 = vld [vmem:[%s659_s4 + $0x10] sm:$0xff]  ;;  %v219_v27 = vld [vmem:[%s658_s3] sm:$0xff] }
   0xf   :  { %v226_v26 = vld [vmem:[%s659_s4 + $0x18] sm:$0xff]  ;;  %437 = vmatprep.mubr.msk.f32.mxu1 %vm247_vm1, %v219_v27  ;;  %v220_v0 = vld [vmem:[%s658_s3 + $0x8] sm:$0xff]  ;;  %v221_v1 = vld [vmem:[%s658_s3 + $0x10] sm:$0xff] }
  0x10   :  { %413 = vmatmul.mubr.msk.f32.gmra.mrb[2].mxu0 %vm81_vm0, %v24_v16  ;;  %v222_v2 = vld [vmem:[%s658_s3 + $0x18] sm:$0xff]  ;;  %s489_s3 = scalar_lea.vmem %s355_s20, 512 }
  0x11   :  { %415 = vmatprep.mubr.msk.f32.mxu0 %vm81_vm0, %v25_v17  ;;  %p490_p0 = scmp.ne.s32.totalorder %s355_s20, %s489_s3  ;;  %p495_p2 = scmp.lt.s32.totalorder %s489_s3, %s489_s3 }
  0x12   :  { %73 = vperm.xlu0 %471, %v39_v18   ;;  %78 = vperm.xlu1 %472, %v40_v19  }
  0x13   :  { %p496_p3 = por %p495_p2, %p494_p1 }
  0x14   :  { %416 = vmatmul.mubr.msk.f32.gmra.mrb[4].mxu0 %vm81_vm0, %v26_v20 }
  0x15   :  { %418 = vmatprep.mubr.msk.f32.mxu0 %vm81_vm0, %v27_v21  ;;  %p497_p4 = pnand %p496_p3, %p490_p0 }
  0x16   :  { %229 = vperm.xlu0 %471, %v223_v22   ;;  %234 = vperm.xlu1 %472, %v224_v23  }
  0x18   :  { %419 = vmatmul.mubr.msk.f32.gmra.mrb[6].mxu0 %vm81_vm0, %v28_v24 }
  0x1a   :  { %239 = vperm.xlu0 %471, %v225_v25   ;;  %244 = vperm.xlu1 %472, %v226_v26  }
  0x82   :  { %v54_v29 = vpop.permute.xlu1 %53 }
  0x83   :  { %v44_v28 = vpop.permute.xlu0 %43 }
  0x89   :  { %v49_v30 = vpop.permute.xlu0 %48  ;;  %v59_v31 = vpop.permute.xlu1 %58 }
  0x8d   :  { %v69_v39 = vpop.permute.xlu1 %68  ;;  %v64_v41 = vpop.permute.xlu0 %63 }
  0x91   :  { %v79_v46 = vpop.permute.xlu1 %78  ;;  %v74_v49 = vpop.permute.xlu0 %73 }
  0x95   :  { %v235_v3 = vpop.permute.xlu1 %234  ;;  %v230_v4 = vpop.permute.xlu0 %229 }
  0x99   :  { %v245_v9 = vpop.permute.xlu1 %244  ;;  %v240_v11 = vpop.permute.xlu0 %239 }
  0xdf   :  { %v411_v32 = vpop.f32.mrb[0].mxu0 }
  0xe0   :  { %v178_v33 = vadd.f32 %v411_v32, %v49_v30  ;;  %v172_v34 = vpop.f32.mrb[1].mxu0 }
  0xe1   :  { %v173_v35 = vadd.f32 %v172_v34, %v44_v28 }
  0xe2   :  { %473 = vtanh.f32 %v178_v33 }
  0xe3   :  { %475 = vtanh.f32 %v173_v35  ;;  %v414_v36 = vpop.f32.mrb[2].mxu0 }
  0xe4   :  { %v188_v37 = vadd.f32 %v414_v36, %v59_v31  ;;  %v182_v38 = vpop.f32.mrb[3].mxu0 }
  0xe5   :  { %v183_v40 = vadd.f32 %v182_v38, %v54_v29 }
  0xe6   :  { %477 = vtanh.f32 %v188_v37 }
  0xe7   :  { %479 = vtanh.f32 %v183_v40  ;;  %v417_v42 = vpop.f32.mrb[4].mxu0 }
  0xe8   :  { %v198_v43 = vadd.f32 %v417_v42, %v69_v39  ;;  %v192_v44 = vpop.f32.mrb[5].mxu0 }
  0xe9   :  { %v193_v45 = vadd.f32 %v192_v44, %v64_v41 }
  0xea   :  { %481 = vtanh.f32 %v198_v43 }
  0xeb   :  { %483 = vtanh.f32 %v193_v45  ;;  %v420_v47 = vpop.f32.mrb[6].mxu0 }
  0xec   :  { %v474_v48 = vpop.eup %473  ;;  %v208_v50 = vadd.f32 %v420_v47, %v79_v46  ;;  %v202_v51 = vpop.f32.mrb[7].mxu0 }
  0xed   :  { %v476_v52 = vpop.eup %475  ;;  %v203_v53 = vadd.f32 %v202_v51, %v74_v49 }
  0xee   :  { %485 = vtanh.f32 %v208_v50  ;;  %v451_v54 = vpack.c.bf16 %v474_v48, %v476_v52 }
  0xef   :  { %487 = vtanh.f32 %v203_v53 }
  0xf0   :  { %v478_v55 = vpop.eup %477  ;;  %452 = vmatprep.subr.bf16.mxu1 %v451_v54 }
  0xf1   :  { %v480_v56 = vpop.eup %479  ;;  %454 = vmatpush3.bf16.msra.mxu1 %v451_v54 }
  0xf2   :  { %v455_v57 = vpack.c.bf16 %v478_v55, %v480_v56 }
  0xf4   :  { %v482_v58 = vpop.eup %481  ;;  %456 = vmatprep.subr.bf16.mxu1 %v455_v57 }
  0xf5   :  { %v484_v59 = vpop.eup %483  ;;  %458 = vmatpush3.bf16.msra.mxu1 %v455_v57 }
  0xf6   :  { %v459_v60 = vpack.c.bf16 %v482_v58, %v484_v59 }
  0xf8   :  { %v486_v61 = vpop.eup %485  ;;  %460 = vmatprep.subr.bf16.mxu1 %v459_v60 }
  0xf9   :  { %v488_v62 = vpop.eup %487  ;;  %462 = vmatpush3.bf16.msra.mxu1 %v459_v60 }
  0xfa   :  { %v463_v63 = vpack.c.bf16 %v486_v61, %v488_v62 }
  0xfc   :  { %464 = vmatprep.subr.bf16.mxu1 %v463_v63 }
  0xfd   :  { %466 = vmatpush3.bf16.msra.mxu1 %v463_v63 }
 0x100   :  { %438 = vmatmul.mubr.msk.f32.vlgmr.msra.gmra.mrb[0].mxu1 %vm247_vm1, %v220_v0 }
 0x101   :  { %440 = vmatprep.mubr.msk.f32.mxu1 %vm247_vm1, %v221_v1 }
 0x104   :  { %441 = vmatmul.mubr.msk.f32.gmra.mrb[2].mxu1 %vm247_vm1, %v222_v2 }
 0x1d3   :  { %v439_v5 = vpop.f32.mrb[0].mxu1 }
 0x1d4   :  { %v332_v6 = vadd.f32 %v439_v5, %v235_v3  ;;  %v326_v7 = vpop.f32.mrb[1].mxu1 }
 0x1d5   :  { %v327_v8 = vadd.f32 %v326_v7, %v230_v4 }
 0x1d6   :  { %346 = vst [vmem:[#allocation2 + $0x8] sm:$0xff] %v332_v6 }
 0x1d7   :  { %345 = vst [vmem:[#allocation2] sm:$0xff] %v327_v8  ;;  %v442_v10 = vpop.f32.mrb[2].mxu1 }
 0x1d8   :  { %v342_v12 = vadd.f32 %v442_v10, %v245_v9  ;;  %v336_v13 = vpop.f32.mrb[3].mxu1 }
 0x1d9   :  { %v337_v14 = vadd.f32 %v336_v13, %v240_v11 }
 0x1da   :  { %348 = vst [vmem:[#allocation2 + $0x18] sm:$0xff] %v342_v12 }
 0x1db   :  { %347 = vst [vmem:[#allocation2 + $0x10] sm:$0xff] %v337_v14 }
 0x1dc   :  { %500 = shalt.err (!%p497_p4)
}
 0x1dd   :  { %s501_s23 = scalar_lea.hbm %s660_s5, 512 }
 0x1de   :  { %p502_p5 = scmp.ne.s32.totalorder %s660_s5, %s501_s23  ;;  %p505_p6 = scmp.lt.u32.totalorder %s501_s23, %s660_s5 }
 0x1e0   :  { %p507_p7 = pnand %p505_p6, %p502_p5 }
 0x1e2   :  { %510 = shalt.err (!%p507_p7)
}
 0x1e3   :  { %s515_s28 = smov 128   ;;  %s516_s29 = smov 8  }
 0x1e4   :  { %360 = dma.vmem_to_hbm [thread:$0]  %s355_s20, 512, %s660_s5, [#allocation3], %s515_s28, %s515_s28, %s516_s29  }
 0x1e5   :  { %511 = dma.done.wait [#allocation3], 512  }
 0x1e6   :  { %512 = vsyncadd [#allocation3], 4294966784 }
 0x1e7   :  { %364 = vsyncpa [#allocation3], 1 }

</bundles_post_ra>
